<compile_context>
chip_gen: v7x
topology: tpu7x:2x2x1
jax: 0.10.0
libtpu: 0.0.40
codegen_flags: <defaults>
</compile_context>

<pallas_src>
import functools

import jax
import jax.numpy as jnp
from jax import lax
from jax.experimental import pallas as pl
from jax.experimental.pallas import tpu as pltpu

BN_EPS = 1e-5
LEAKY_SLOPE = 0.2
KW = 4            # conv kernel size
LANE = 128        # TPU lane width
# Below v5e/v6e physical VMEM and inside v7x's 64 MiB with headroom; above the
# 16/32 MiB default scoped limits.
VMEM_LIMIT_BYTES = 48 * 1024 * 1024


# --------------------------- Pallas kernel -----------------------------------
def _conv_taps_kernel(x_ref, w_ref, scale_ref, shift_ref, o_ref, *,
                      taps, th, wo, tn, neg_slope):
    """Fused 4x4-conv stage: conv-as-MXU-matmuls + folded affine + LeakyReLU.

    x_ref:     (1, P, Ht, Wt, Kin)  bf16 padded (phase-decomposed / im2col) image
    w_ref:     (num_taps, Kin, TN)  bf16 weights, tap-major
    scale_ref: (1, TN)              f32 folded BN scale (or ones)
    shift_ref: (1, TN)              f32 folded BN shift (or conv bias)
    o_ref:     (1, TH, Wo, TN)      one output row-strip / Cout tile
    """
    kin = x_ref.shape[-1]
    rt = pl.program_id(2)                      # row-strip index (innermost axis)
    r0 = pl.multiple_of(rt * th, th)

    acc = jnp.zeros((th * wo, tn), dtype=jnp.float32)
    for t, (p_idx, qh, qw) in enumerate(taps):
        # Activations are already bf16 (cast hoisted out of the kernel), so the
        # MXU operands need no per-tap VPU casts; slices are dense/unstrided.
        patch = x_ref[0, p_idx, pl.ds(r0 + qh, th), pl.ds(qw, wo), :]
        acc = acc + jnp.dot(patch.reshape(th * wo, kin), w_ref[t],
                            preferred_element_type=jnp.float32)

    y = acc * scale_ref[...] + shift_ref[...]
    if neg_slope is not None:
        y = jnp.where(y >= 0.0, y, neg_slope * y)
    o_ref[0] = y.reshape(o_ref.shape[1:]).astype(o_ref.dtype)


# ----------------------------- layer wrapper ----------------------------------
def _pick_row_tile(ho, wo):
    """Output row-strip height: whole image when small, otherwise a multiple of
    8 that keeps the (TH*Wo, TN) accumulator near vreg scale."""
    if ho * wo <= 2048:
        return ho
    th = max(8, (1024 // max(wo, 1)) // 8 * 8)
    return th if th < ho else ho


def _conv_block(x_nhwc, w_hwio, scale, shift, *, stride, neg_slope, out_dtype):
    """One discriminator stage on a bf16 NHWC activation."""
    B, H, W, Cin = x_nhwc.shape
    Cout = w_hwio.shape[-1]
    Ho = (H + 2 - KW) // stride + 1
    Wo = (W + 2 - KW) // stride + 1

    # Conv2d padding=1 (zero pad) done once by XLA per layer.
    xp = jnp.pad(x_nhwc, ((0, 0), (1, 1), (1, 1), (0, 0)))

    # ---- choose the MXU feeding strategy for this layer ----------------------
    if Cin * KW * KW <= 2 * LANE:
        # Small-Cin layers (e.g. the RGB input layer): im2col all 16 taps into
        # the contraction dim -> one K = 16*Cin matmul instead of sixteen
        # K = Cin pushes (fills the 128/256-deep MXU contraction).
        cols = []
        for dh in range(KW):
            for dw in range(KW):
                cols.append(xp[:, dh:dh + (Ho - 1) * stride + 1:stride,
                               dw:dw + (Wo - 1) * stride + 1:stride, :])
        xps = jnp.stack(cols, axis=-2).reshape(B, 1, Ho, Wo, KW * KW * Cin)
        taps = ((0, 0, 0),)
        kin = KW * KW * Cin
        q_max = 0
        w3 = w_hwio.reshape(1, KW * KW * Cin, Cout)
    else:
        # Phase decomposition: tap (dh, dw) of the strided conv becomes a dense,
        # unstrided slice of phase (dh % s, dw % s) inside the kernel.
        s = stride
        Hp, Wp = H + 2, W + 2
        Hp2, Wp2 = -(-Hp // s) * s, -(-Wp // s) * s
        if (Hp2, Wp2) != (Hp, Wp):          # keep every phase the same shape
            xp = jnp.pad(xp, ((0, 0), (0, Hp2 - Hp), (0, Wp2 - Wp), (0, 0)))
        phases = [xp[:, ph::s, pw::s, :] for ph in range(s) for pw in range(s)]
        xps = jnp.stack(phases, axis=1)                  # (B, s*s, Ht, Wt, Cin)
        taps = tuple(((dh % s) * s + (dw % s), dh // s, dw // s)
                     for dh in range(KW) for dw in range(KW))
        kin = Cin
        q_max = (KW - 1) // s
        w3 = w_hwio.reshape(KW * KW, Cin, Cout)

    # ---- row-strip / Cout tiling ---------------------------------------------
    th = _pick_row_tile(Ho, Wo)
    num_rt = (Ho + th - 1) // th
    ho_pad = num_rt * th
    ht_req = ho_pad + q_max
    if xps.shape[2] < ht_req:               # keep in-kernel row slices in bounds
        xps = jnp.pad(xps, ((0, 0), (0, 0), (0, ht_req - xps.shape[2]),
                            (0, 0), (0, 0)))
    _, P, Ht, Wt, _ = xps.shape

    if Cout > LANE and Cout % LANE == 0:
        tn, num_ct = LANE, Cout // LANE
    else:
        tn, num_ct = Cout, 1

    num_taps = len(taps)
    w3 = w3.astype(jnp.bfloat16)
    scale2 = scale.reshape(1, Cout).astype(jnp.float32)
    shift2 = shift.reshape(1, Cout).astype(jnp.float32)

    kernel = functools.partial(_conv_taps_kernel, taps=taps, th=th, wo=Wo,
                               tn=tn, neg_slope=neg_slope)

    # Grid: (batch, Cout tile, row strip). Row strips innermost so the
    # grid-invariant input (per image) and weight (per Cout tile) blocks are
    # re-fetched as rarely as possible; all axes are independent => "parallel"
    # so v7x shards them across both TensorCores even at B=1.
    y = pl.pallas_call(
        kernel,
        out_shape=jax.ShapeDtypeStruct((B, ho_pad, Wo, Cout), out_dtype),
        grid_spec=pltpu.PrefetchScalarGridSpec(
            num_scalar_prefetch=0,
            grid=(B, num_ct, num_rt),
            in_specs=[
                pl.BlockSpec((1, P, Ht, Wt, kin),
                             lambda b, ct, rt: (b, 0, 0, 0, 0)),
                pl.BlockSpec((num_taps, kin, tn),
                             lambda b, ct, rt: (0, 0, ct)),
                pl.BlockSpec((1, tn), lambda b, ct, rt: (0, ct)),
                pl.BlockSpec((1, tn), lambda b, ct, rt: (0, ct)),
            ],
            out_specs=pl.BlockSpec((1, th, Wo, tn),
                                   lambda b, ct, rt: (b, rt, 0, ct)),
        ),
        compiler_params=pltpu.CompilerParams(
            dimension_semantics=("parallel", "parallel", "parallel"),
            vmem_limit_bytes=VMEM_LIMIT_BYTES),
    )(xps, w3, scale2, shift2)

    return y[:, :Ho] if ho_pad != Ho else y


# ----------------------------- model wrapper ---------------------------------
def discriminator_forward(x_nchw, layers):
    """Full PatchGAN discriminator forward. x_nchw: (B, C, H, W) float32."""
    # NCHW -> NHWC exactly once; bf16 activations between layers halve HBM DMA.
    x = jnp.transpose(x_nchw, (0, 2, 3, 1)).astype(jnp.bfloat16)
    for i, layer in enumerate(layers):
        last = i + 1 == len(layers)
        x = _conv_block(x, layer["w"], layer["scale"], layer["shift"],
                        stride=layer["stride"], neg_slope=layer["neg_slope"],
                        out_dtype=jnp.float32 if last else jnp.bfloat16)
    return jnp.transpose(x, (0, 3, 1, 2))            # NHWC -> NCHW, once


def build_discriminator_params(key, input_nc, ndf=64, n_layers=3):
    """Random parameters mirroring the PyTorch module (norm=BatchNorm2d =>
    use_bias=False on the middle convs). BatchNorm is folded (inference mode)
    into a per-channel scale/shift."""
    # TODO(synk): training-mode BatchNorm2d (batch statistics) not implemented;
    # eval-mode running statistics are folded into scale/shift.
    keys = iter(jax.random.split(key, 64))

    def conv_w(k, cin, cout):
        return (jax.random.normal(k, (KW, KW, cin, cout), jnp.float32)
                / jnp.sqrt(float(KW * KW * cin)))

    layers = []

    # Layer 0: Conv(input_nc -> ndf, s2, bias=True) + LeakyReLU (no norm).
    w = conv_w(next(keys), input_nc, ndf)
    b = 0.1 * jax.random.normal(next(keys), (ndf,), jnp.float32)
    layers.append(dict(w=w, scale=jnp.ones((ndf,), jnp.float32), shift=b,
                       stride=2, neg_slope=LEAKY_SLOPE))

    nf_mult = 1
    for n in range(1, n_layers + 1):
        nf_mult_prev = nf_mult
        nf_mult = min(2 ** n, 8)
        cin, cout = ndf * nf_mult_prev, ndf * nf_mult
        stride = 2 if n < n_layers else 1
        w = conv_w(next(keys), cin, cout)
        gamma = 1.0 + 0.1 * jax.random.normal(next(keys), (cout,), jnp.float32)
        beta = 0.1 * jax.random.normal(next(keys), (cout,), jnp.float32)
        rmean = 0.1 * jax.random.normal(next(keys), (cout,), jnp.float32)
        rvar = 1.0 + 0.1 * jnp.abs(
            jax.random.normal(next(keys), (cout,), jnp.float32))
        scale = gamma / jnp.sqrt(rvar + BN_EPS)
        shift = beta - rmean * scale
        layers.append(dict(w=w, scale=scale, shift=shift,
                           stride=stride, neg_slope=LEAKY_SLOPE))

    # Final layer: Conv(ndf*nf_mult -> 1, s1, bias=True), no norm/activation.
    w = conv_w(next(keys), ndf * nf_mult, 1)
    b = 0.1 * jax.random.normal(next(keys), (1,), jnp.float32)
    layers.append(dict(w=w, scale=jnp.ones((1,), jnp.float32), shift=b,
                       stride=1, neg_slope=None))
    return layers


# ---------------- pure-JAX reference (same bf16 numerics) --------------------
def discriminator_ref(x_nchw, layers):
    x = jnp.transpose(x_nchw, (0, 2, 3, 1)).astype(jnp.bfloat16)
    y = None
    for layer in layers:
        y = lax.conv_general_dilated(
            x, layer["w"].astype(jnp.bfloat16),
            window_strides=(layer["stride"],) * 2,
            padding=((1, 1), (1, 1)),
            dimension_numbers=("NHWC", "HWIO", "NHWC"),
            preferred_element_type=jnp.float32)
        y = (y * layer["scale"][None, None, None, :]
             + layer["shift"][None, None, None, :])
        if layer["neg_slope"] is not None:
            y = jnp.where(y >= 0.0, y, layer["neg_slope"] * y)
        x = y.astype(jnp.bfloat16)          # bf16 carry, same as the kernel path
    return jnp.transpose(y, (0, 3, 1, 2))


if __name__ == "__main__":
    # Small but valid shapes: 32x32 input so the last two (kw=4) convs still
    # produce positive spatial extents. 32 -> 16 -> 8 -> 4 -> 3 -> 2.
    B, input_nc, H, W = 2, 3, 32, 32
    ndf, n_layers = 8, 3

    key = jax.random.PRNGKey(0)
    kx, kp = jax.random.split(key)
    x = jax.random.normal(kx, (B, input_nc, H, W), dtype=jnp.float32)
    layers = build_discriminator_params(kp, input_nc, ndf=ndf,
                                        n_layers=n_layers)

    out = jax.block_until_ready(discriminator_forward(x, layers))
    ref = jax.block_until_ready(discriminator_ref(x, layers))

    assert out.shape == ref.shape == (B, 1, 2, 2), out.shape
    err = float(jnp.max(jnp.abs(out - ref)))
    assert err < 2e-2, f"mismatch vs JAX reference: {err}"

    print("KERNEL_OK")
</pallas_src>

<mosaic_0001>
module attributes {stable_mosaic.version = 11 : i64} {
  func.func @_conv_taps_kernel(%arg0: i32, %arg1: i32, %arg2: i32, %arg3: memref<1x1x16x16x48xbf16, #tpu.memory_space<vmem>>, %arg4: memref<1x48x8xbf16, #tpu.memory_space<vmem>>, %arg5: memref<1x8xf32, #tpu.memory_space<vmem>>, %arg6: memref<1x8xf32, #tpu.memory_space<vmem>>, %arg7: memref<1x16x16x8xbf16, #tpu.memory_space<vmem>>) attributes {dimension_semantics = [#tpu.dimension_semantics<parallel>, #tpu.dimension_semantics<parallel>, #tpu.dimension_semantics<parallel>], iteration_bounds = array<i64: 2, 1, 1>, scalar_prefetch = 0 : i64, scratch_operands = 0 : i64, tpu.core_type = #tpu.core_type<tc>, window_params = [{transform_indices = @transform_0, window_bounds = array<i64: 1, 1, 16, 16, 48>}, {transform_indices = @transform_1, window_bounds = array<i64: 1, 48, 8>}, {transform_indices = @transform_2, window_bounds = array<i64: 1, 8>}, {transform_indices = @transform_3, window_bounds = array<i64: 1, 8>}, {transform_indices = @transform_4, window_bounds = array<i64: 1, 16, 16, 8>}]} {
    %c16_i32 = arith.constant 16 : i32
    %0 = arith.muli %arg2, %c16_i32 : i32
    %1 = tpu.assume_multiple %0, 16 : i32
    %cst = arith.constant 0.000000e+00 : f32
    %2 = vector.broadcast %cst : f32 to vector<256x8xf32>
    %c0_i32 = arith.constant 0 : i32
    %3 = arith.addi %1, %c0_i32 : i32
    %c0 = arith.constant 0 : index
    %c0_0 = arith.constant 0 : index
    %4 = arith.index_cast %3 : i32 to index
    %c0_1 = arith.constant 0 : index
    %c0_2 = arith.constant 0 : index
    %5 = vector.load %arg3[%c0, %c0_0, %4, %c0_1, %c0_2] : memref<1x1x16x16x48xbf16, #tpu.memory_space<vmem>>, vector<1x1x16x16x48xbf16>
    %6 = vector.shape_cast %5 : vector<1x1x16x16x48xbf16> to vector<16x16x48xbf16>
    %7 = vector.shape_cast %6 : vector<16x16x48xbf16> to vector<256x48xbf16>
    %c0_3 = arith.constant 0 : index
    %c0_4 = arith.constant 0 : index
    %c0_5 = arith.constant 0 : index
    %8 = vector.load %arg4[%c0_3, %c0_4, %c0_5] : memref<1x48x8xbf16, #tpu.memory_space<vmem>>, vector<1x48x8xbf16>
    %9 = vector.shape_cast %8 : vector<1x48x8xbf16> to vector<48x8xbf16>
    %cst_6 = arith.constant dense<0.000000e+00> : vector<256x8xf32>
    %10 = tpu.matmul %7, %9, %cst_6 {dimension_numbers = #tpu.dot_dimension_numbers<[1], [0], [0], [1], [0, 0, 1, 1], [], []>} : vector<256x48xbf16>, vector<48x8xbf16>, vector<256x8xf32> -> vector<256x8xf32>
    %11 = arith.addf %2, %10 : vector<256x8xf32>
    %c0_7 = arith.constant 0 : index
    %c0_8 = arith.constant 0 : index
    %12 = vector.load %arg5[%c0_7, %c0_8] : memref<1x8xf32, #tpu.memory_space<vmem>>, vector<1x8xf32>
    %13 = vector.broadcast %12 : vector<1x8xf32> to vector<256x8xf32>
    %14 = arith.mulf %11, %13 : vector<256x8xf32>
    %c0_9 = arith.constant 0 : index
    %c0_10 = arith.constant 0 : index
    %15 = vector.load %arg6[%c0_9, %c0_10] : memref<1x8xf32, #tpu.memory_space<vmem>>, vector<1x8xf32>
    %16 = vector.broadcast %15 : vector<1x8xf32> to vector<256x8xf32>
    %17 = arith.addf %14, %16 : vector<256x8xf32>
    %cst_11 = arith.constant 0.000000e+00 : f32
    %18 = vector.broadcast %cst_11 : f32 to vector<256x8xf32>
    %19 = arith.cmpf oge, %17, %18 : vector<256x8xf32>
    %cst_12 = arith.constant 2.000000e-01 : f32
    %20 = vector.broadcast %cst_12 : f32 to vector<256x8xf32>
    %21 = arith.mulf %20, %17 : vector<256x8xf32>
    %22 = arith.select %19, %17, %21 : vector<256x8xi1>, vector<256x8xf32>
    %23 = vector.shape_cast %22 : vector<256x8xf32> to vector<16x16x8xf32>
    %24 = arith.truncf %23 : vector<16x16x8xf32> to vector<16x16x8xbf16>
    %c0_13 = arith.constant 0 : index
    %c0_14 = arith.constant 0 : index
    %c0_15 = arith.constant 0 : index
    %c0_16 = arith.constant 0 : index
    %25 = vector.load %arg7[%c0_13, %c0_14, %c0_15, %c0_16] : memref<1x16x16x8xbf16, #tpu.memory_space<vmem>>, vector<1x16x16x8xbf16>
    %26 = vector.shape_cast %25 : vector<1x16x16x8xbf16> to vector<16x16x8xbf16>
    %27 = vector.shape_cast %24 : vector<16x16x8xbf16> to vector<1x16x16x8xbf16>
    tpu.vector_store %arg7[%c0_13, %c0_14, %c0_15, %c0_16], %27 {strides = array<i32>} : memref<1x16x16x8xbf16, #tpu.memory_space<vmem>>, vector<1x16x16x8xbf16>,
    return
  }
  func.func @transform_0(%arg0: i32, %arg1: i32, %arg2: i32) -> (i32, i32, i32, i32, i32) {
    %c0_i32 = arith.constant 0 : i32
    %c0_i32_0 = arith.constant 0 : i32
    %c0_i32_1 = arith.constant 0 : i32
    %c0_i32_2 = arith.constant 0 : i32
    %c0_i32_3 = arith.constant 0 : i32
    return %arg0, %c0_i32, %c0_i32_0, %c0_i32_1, %c0_i32_2 : i32, i32, i32, i32, i32
  }
  func.func @transform_1(%arg0: i32, %arg1: i32, %arg2: i32) -> (i32, i32, i32) {
    %c0_i32 = arith.constant 0 : i32
    %c0_i32_0 = arith.constant 0 : i32
    %c0_i32_1 = arith.constant 0 : i32
    return %c0_i32, %c0_i32_0, %arg1 : i32, i32, i32
  }
  func.func @transform_2(%arg0: i32, %arg1: i32, %arg2: i32) -> (i32, i32) {
    %c0_i32 = arith.constant 0 : i32
    %c0_i32_0 = arith.constant 0 : i32
    return %c0_i32, %arg1 : i32, i32
  }
  func.func @transform_3(%arg0: i32, %arg1: i32, %arg2: i32) -> (i32, i32) {
    %c0_i32 = arith.constant 0 : i32
    %c0_i32_0 = arith.constant 0 : i32
    return %c0_i32, %arg1 : i32, i32
  }
  func.func @transform_4(%arg0: i32, %arg1: i32, %arg2: i32) -> (i32, i32, i32, i32) {
    %c0_i32 = arith.constant 0 : i32
    %c0_i32_0 = arith.constant 0 : i32
    return %arg0, %arg2, %c0_i32, %arg1 : i32, i32, i32, i32
  }
}

</mosaic_0001>

<bundles_post_ra>
// kernel: tpu_custom_call.1
= control target key start
LH: loop header
LB: loop body
LE: loop exit
PB: predicated region body
PF: predicated region fallthrough
CT: control target
= control target key end

     0   :  { %9 = vsyncpa [#allocation3], 0  ;;  %s1846_s0 = inlined_call_operand.hbm [shape: bf16[2,1,16,16,48], index: 0, kind: input, shape index: {}]   ;;  %s1847_s1 = inlined_call_operand.vmem [shape: bf16[1,48,8], index: 1, kind: input, shape index: {}]   ;;  %s1848_s2 = inlined_call_operand.vmem [shape: f32[1,8], index: 2, kind: input, shape index: {}]   ;;  %s1849_s3 = inlined_call_operand.vmem [shape: f32[1,8], index: 3, kind: input, shape index: {}]   ;;  %s1850_s4 = inlined_call_operand.vmem [shape: bf16[2,16,16,8], index: 4, kind: output, shape index: {}]  }
   0x1   :  { %11 = vsyncpa [#allocation3 + $0x1], 0  ;;  %s1509_s15 = smov 0   ;;  %s1511_s16 = smov 0  }
   0x2   :  { %s1513_s17 = smov 0   ;;  %s1515_s18 = smov 0  }
   0x3   :  { %s1517_s19 = smov 0   ;;  %s1519_s20 = smov 0  }
   0x4 LB: > { %s1141_s21 = sadd.s32 4294967295, %s1479_s20   ;;  %s36_s22 = sadd.s32 1, %s1475_s19  ;;  %s1479_s20 = sphi %s1519_s20, %s17_s20   ;;  %s1475_s19 = sphi %s1517_s19, %s1858_s19   ;;  %s1471_s18 = sphi %s1515_s18, %s1857_s18   ;;  %s1467_s17 = sphi %s1513_s17, %s1856_s17   ;;  %s1463_s16 = sphi %s1511_s16, %s1855_s16   ;;  %s1459_s15 = sphi %s1509_s15, %s1854_s15  }
   0x5   : > { %p38_p0 = scmp.ge.s32.totalorder %s36_s22, 2  ;;  %s43_s23 = sadd.s32 1, %s1467_s17 }
   0x6   : > { %p50_p1 = scmp.ne.s32.totalorder %s1467_s17, %s1463_s16  ;;  %p51_p2 = scmp.eq.s32.totalorder %s1479_s20, 0 }
   0x7   : > { %s1860_s22 = smov (%p38_p0, %s36_s22), 0  ;;  %p56_p4 = scmp.ne.s32.totalorder %s1463_s16, %s1459_s15 }
   0x8   : > { %p1545_p3 = por %p51_p2, %p50_p1  ;;  %s40_s25 = ssub.s32 %s1475_s19, %s1860_s22 }
   0x9   : > { %p57_p5 = scmp.eq.s32.totalorder %s1141_s21, 0  ;;  %p41_p6 = scmp.eq.s32.totalorder %s40_s25, 0 }
   0xa   : > { %p1329_p8 = scmp.lt.s32.totalorder %s1479_s20, 2  ;;  %s207_s28 = sand.u32 1, %s1467_s17  }
   0xb   : > { %p1552_p7 = por %p57_p5, %p56_p4  ;;  %s1226_s29 = sshll.u32 %s1475_s19, 11 }
   0xc   : > { %s1558_s27 = scalar_select %p41_p6, %s1467_s17, %s43_s23  }
   0xd   : > { %s1148_s30 = sshll.u32 %s207_s28, 7  ;;  %s1565_s7 = scalar_lea.hbm %s1846_s0, %s1226_s29 }
   0xe   : > { %s211_s8 = scalar_lea.vmem [#allocation2], %s1148_s30  ;;  %p1569_p9 = pnand %p1329_p8, %p1545_p3 }
   0xf   : > { %s218_s9 = sshll.u32 %s211_s8, 4  ;;  %s1575_s11 = scalar_lea.sflag [#allocation3], %s207_s28  ;;  %s1573_s9 = int_to_ptr.vmem [resolvable:$true] %s218_s9 }
  0x10   : > { %s1399_s12 = scalar_lea.hbm %s1565_s7, 2048  ;;  %p1401_p11 = pneg %p1569_p9 }
  0x11   : > { %p1400_p10 = scmp.ne.s32.totalorder %s1565_s7, %s1399_s12  ;;  %s1404_s15 = scalar_lea.hbm %s1846_s0, 4096 }
  0x12   : > { %p1405_p0 = scmp.lt.u32.totalorder %s1565_s7, %s1846_s0  ;;  %p1406_p1 = scmp.lt.u32.totalorder %s1404_s15, %s1399_s12 }
  0x13   : > { %p1402_p12 = pnand %p1401_p11, %p1400_p10  ;;  %p1408_p3 = scmp.lt.u32.totalorder %s1399_s12, %s1565_s7 }
  0x14   : > { %p1407_p2 = por %p1406_p1, %p1405_p0 }
  0x15   : > { %p1403_p13 = pneg %p1402_p12 }
  0x16   : > { %p1409_p4 = por %p1408_p3, %p1407_p2 }
  0x18   : > { %p1410_p5 = pnand %p1409_p4, %p1403_p13 }
  0x1a   : > { %1413 = shalt.err (!%p1410_p5)
}
  0x1b   : > { %s1414_s24 = scalar_lea.vmem %s1573_s9, 2048  ;;  %s1481_s25 = smov [#allocation2]  }
  0x1c   : > { %p1415_p6 = scmp.ne.s32.totalorder %s1573_s9, %s1414_s24  ;;  %s1419_s28 = sshll.u32 %s1481_s25, 4  ;;  %s1420_s28 = int_to_ptr.vmem [resolvable:$false] %s1419_s28 }
  0x1d   : > { %s1421_s29 = scalar_lea.vmem %s1420_s28, 4096  ;;  %p1422_p12 = scmp.lt.s32.totalorder %s1573_s9, %s1420_s28 }
  0x1e   : > { %p1417_p8 = pnand %p1415_p6, %p1401_p11  ;;  %p1423_p0 = scmp.lt.s32.totalorder %s1421_s29, %s1414_s24 }
  0x20   : > { %p1418_p10 = pneg %p1417_p8  ;;  %p1424_p1 = por %p1423_p0, %p1422_p12 }
  0x22   : > { %p1425_p2 = pnand %p1424_p1, %p1418_p10 }
  0x24   : > { %1428 = shalt.err (!%p1425_p2)
}
  0x25   : > { %s1482_s30 = smov 64   ;;  %s1483_s5 = smov 4  }
  0x26   : > { %1328 = dma.hbm_to_vmem [thread:$0]  (!%p1569_p9), %s1565_s7, 2048, %s1573_s9, %s1575_s11, %s1482_s30, %s1482_s30, %s1483_s5  }
  0x27   : > { %p1151_p11 = scmp.ge.s32.totalorder %s1479_s20, 1  ;;  %p226_p13 = scmp.lt.s32.totalorder %s1479_s20, 3 }
  0x29   : > { %p227_p3 = pnand %p1151_p11, %p226_p13 }
  0x2a   : > { %s232_s6 = sand.u32 (!%p227_p3), 1, %s1463_s16  }
  0x2b   : > { %230 = sbr.rel (%p227_p3) target bundleno = 330 (0x14a), region = 36  ;;  %s1152_s8 = sshll.u32 (!%p227_p3), %s232_s6, 7 }
  0x2c   : > { %s233_s12 = scalar_lea.sflag (!%p227_p3), [#allocation3], %s232_s6  ;;  %s1606_s13 = scalar_lea.vmem (!%p227_p3), [#allocation2], %s1152_s8 }
  0x32   : > { %1454 = dma.done.wait (%p1552_p7), %s233_s12, 2048  }
  0x33   : > { %1456 = vsyncadd (%p1552_p7), %s233_s12, 4294965248  ;;  %v1380_v0 = vld [vmem:[%s1847_s1] sm:$0xff]   ;;  %v1381_v1 = vld [vmem:[%s1847_s1 + $0x8] sm:$0xff]   ;;  %vm444_vm0 = vcmask 392192   ;;  %p290_p7 = scmp.lt.s32.totalorder %s1471_s18, 1  ;;  %vm956_vm1 = vcmask 60416  }
  0x34   : > { %1279 = vmatprep.subr.bf16.mxu0 %v1380_v0  ;;  %1317 = vmatprep.subr.bf16.mxu1 %v1380_v0  ;;  %v1382_v2 = vld [vmem:[%s1847_s1 + $0x10] sm:$0xff]   ;;  %v1383_v3 = vld [vmem:[%s1606_s13] sm:$0xff]   ;;  %v1385_v5 = vld [vmem:[%s1606_s13 + $0x8] sm:$0xff]  }
  0x35   : > { %1280 = vmatpush3.bf16.msra.mxu0 %v1380_v0  ;;  %1320 = vmatpush3.bf16.msra.mxu1 %v1380_v0  ;;  %v1384_v4 = vld [vmem:[%s1606_s13 + $0x40] sm:$0xff]   ;;  %v1386_v6 = vld [vmem:[%s1606_s13 + $0x48] sm:$0xff]   ;;  %v1387_v7 = vld [vmem:[%s1606_s13 + $0x10] sm:$0xff]   ;;  %s1862_s18 = smov (!%p290_p7, %s1471_s18), 1 }
  0x36   : > { %1281 = vmatprep.subr.bf16.mxu0 %v1381_v1  ;;  %1318 = vmatprep.subr.bf16.mxu1 %v1381_v1  ;;  %v1388_v8 = vld [vmem:[%s1606_s13 + $0x50] sm:$0xff]   ;;  %v1389_v9 = vld [vmem:[%s1606_s13 + $0x18] sm:$0xff]   ;;  %v1391_v11 = vld [vmem:[%s1606_s13 + $0x20] sm:$0xff]   ;;  %s1227_s25 = sshll.u32 %s1862_s18, 7 }
  0x37   : > { %1285 = vmatprep.mubr.msk.bf16.mxu0 %vm444_vm0, %v1383_v3  ;;  %1301 = vmatprep.mubr.msk.bf16.mxu1 %vm444_vm0, %v1384_v4  ;;  %v1390_v10 = vld [vmem:[%s1606_s13 + $0x58] sm:$0xff]   ;;  %v1392_v12 = vld [vmem:[%s1606_s13 + $0x60] sm:$0xff]   ;;  %v1393_v13 = vld [vmem:[%s1606_s13 + $0x28] sm:$0xff]   ;;  %s1683_s18 = scalar_lea.vmem %s1850_s4, %s1227_s25 }
  0x38   : > { %v1394_v14 = vld [vmem:[%s1606_s13 + $0x68] sm:$0xff]   ;;  %v1395_v15 = vld [vmem:[%s1606_s13 + $0x30] sm:$0xff]   ;;  %v1397_v17 = vld [vmem:[%s1606_s13 + $0x38] sm:$0xff]  }
  0x39   : > { %1282 = vmatpush3.bf16.msra.mxu0 %v1381_v1  ;;  %1321 = vmatpush3.bf16.msra.mxu1 %v1381_v1  ;;  %v1396_v16 = vld [vmem:[%s1606_s13 + $0x70] sm:$0xff]   ;;  %v1398_v18 = vld [vmem:[%s1606_s13 + $0x78] sm:$0xff]   ;;  %v1657_v19 = vld [vmem:[%s1848_s2] ss:$0 sm:$0xff] }
  0x3a   : > { %1283 = vmatprep.subr.bf16.mxu0 %v1382_v2  ;;  %1319 = vmatprep.subr.bf16.mxu1 %v1382_v2  ;;  %v1665_v21 = vld [vmem:[%s1849_s3] ss:$0 sm:$0xff] }
  0x3d   : > { %1284 = vmatpush3.bf16.msra.mxu0 %v1382_v2  ;;  %1322 = vmatpush3.bf16.msra.mxu1 %v1382_v2 }
  0x40   : > { %1286 = vmatmul.mubr.msk.bf16.vlgmr.msra.gmra.mrb[0].mxu0 %vm444_vm0, %v1385_v5  ;;  %1302 = vmatmul.mubr.msk.bf16.vlgmr.msra.gmra.mrb[0].mxu1 %vm444_vm0, %v1386_v6 }
  0x41   : > { %1289 = vmatprep.mubr.msk.bf16.mxu0 %vm444_vm0, %v1387_v7  ;;  %1305 = vmatprep.mubr.msk.bf16.mxu1 %vm444_vm0, %v1388_v8 }
  0x48   : > { %1290 = vmatmul.mubr.msk.bf16.gmra.mrb[4].mxu0 %vm444_vm0, %v1389_v9  ;;  %1306 = vmatmul.mubr.msk.bf16.gmra.mrb[4].mxu1 %vm444_vm0, %v1390_v10 }
  0x49   : > { %1293 = vmatprep.mubr.msk.bf16.mxu0 %vm444_vm0, %v1391_v11  ;;  %1309 = vmatprep.mubr.msk.bf16.mxu1 %vm444_vm0, %v1392_v12 }
  0x50   : > { %1294 = vmatmul.mubr.msk.bf16.gmra.mrb[8].mxu0 %vm444_vm0, %v1393_v13  ;;  %1310 = vmatmul.mubr.msk.bf16.gmra.mrb[8].mxu1 %vm444_vm0, %v1394_v14 }
  0x51   : > { %1297 = vmatprep.mubr.msk.bf16.mxu0 %vm444_vm0, %v1395_v15  ;;  %1313 = vmatprep.mubr.msk.bf16.mxu1 %vm444_vm0, %v1396_v16 }
  0x58   : > { %1298 = vmatmul.mubr.msk.bf16.gmra.mrb[12].mxu0 %vm444_vm0, %v1397_v17  ;;  %1314 = vmatmul.mubr.msk.bf16.gmra.mrb[12].mxu1 %vm444_vm0, %v1398_v18 }
 0x113   : > { %v1287_v20 = vpop.f32.mrb[0].mxu0  ;;  %v1303_v22 = vpop.f32.mrb[0].mxu1 }
 0x114   : > { %v663_v23 = vmul.f32 %v1287_v20, %v1657_v19  ;;  %v679_v24 = vmul.f32 %v1303_v22, %v1657_v19  ;;  %v527_v25 = vpop.f32.mrb[1].mxu0  ;;  %v591_v26 = vpop.f32.mrb[1].mxu1 }
 0x115   : > { %v661_v27 = vmul.f32 %v1657_v19, %v527_v25  ;;  %v677_v28 = vmul.f32 %v1657_v19, %v591_v26  ;;  %v1288_v29 = vpop.f32.mrb[2].mxu0  ;;  %v1304_v30 = vpop.f32.mrb[2].mxu1 }
 0x116   : > { %v702_v31 = vadd.f32 %v1665_v21, %v663_v23  ;;  %v718_v32 = vadd.f32 %v1665_v21, %v679_v24  ;;  %v664_v33 = vmul.f32 %v1288_v29, %v1657_v19  ;;  %v680_v34 = vmul.f32 %v1304_v30, %v1657_v19  ;;  %v530_v35 = vpop.f32.mrb[3].mxu0  ;;  %v594_v36 = vpop.f32.mrb[3].mxu1 }
 0x117   : > { %v700_v37 = vadd.f32 %v1665_v21, %v661_v27  ;;  %v716_v38 = vadd.f32 %v1665_v21, %v677_v28  ;;  %v662_v39 = vmul.f32 %v1657_v19, %v530_v35  ;;  %v678_v40 = vmul.f32 %v1657_v19, %v594_v36 }
 0x118   : > { %vm734_vm2 = vcmp.ge.f32.partialorder %v702_v31, 0.0  ;;  %v766_v41 = vmul.f32 0.2, %v702_v31  ;;  %vm750_vm3 = vcmp.ge.f32.partialorder %v718_v32, 0.0  ;;  %v782_v42 = vmul.f32 0.2, %v718_v32 }
 0x119   : > { %vm732_vm4 = vcmp.ge.f32.partialorder %v700_v37, 0.0  ;;  %v764_v43 = vmul.f32 0.2, %v700_v37  ;;  %vm748_vm5 = vcmp.ge.f32.partialorder %v716_v38, 0.0  ;;  %v780_v44 = vmul.f32 0.2, %v716_v38 }
 0x11a   : > { %v798_v45 = vsel %vm734_vm2, %v702_v31, %v766_v41  ;;  %v814_v46 = vsel %vm750_vm3, %v718_v32, %v782_v42  ;;  %v703_v47 = vadd.f32 %v1665_v21, %v664_v33  ;;  %v719_v48 = vadd.f32 %v1665_v21, %v680_v34 }
 0x11b   : > { %v1230_v49 = vpack.c.bf16 %v798_v45, %v798_v45  ;;  %v1246_v50 = vpack.c.bf16 %v814_v46, %v814_v46  ;;  %v796_v51 = vsel %vm732_vm4, %v700_v37, %v764_v43  ;;  %v812_v52 = vsel %vm748_vm5, %v716_v38, %v780_v44  ;;  %v1291_v53 = vpop.f32.mrb[4].mxu0  ;;  %v1307_v54 = vpop.f32.mrb[4].mxu1 }
 0x11c   : > { %v1228_v55 = vpack.c.bf16 %v796_v51, %v796_v51  ;;  %v1244_v56 = vpack.c.bf16 %v812_v52, %v812_v52  ;;  %vm735_vm6 = vcmp.ge.f32.partialorder %v703_v47, 0.0  ;;  %v767_v57 = vmul.f32 0.2, %v703_v47  ;;  %v543_v58 = vpop.f32.mrb[5].mxu0  ;;  %v607_v59 = vpop.f32.mrb[5].mxu1 }
 0x11d   : > { %959 = vst.msk [vmem:[%s1683_s18 + $0x8] sm:$0xf] %vm956_vm1, %v1230_v49  ;;  %975 = vst.msk [vmem:[%s1683_s18 + $0x48] sm:$0xf] %vm956_vm1, %v1246_v50  ;;  %vm751_vm7 = vcmp.ge.f32.partialorder %v719_v48, 0.0  ;;  %v701_v61 = vadd.f32 %v1665_v21, %v662_v39  ;;  %v717_v62 = vadd.f32 %v1665_v21, %v678_v40  ;;  %v1292_v63 = vpop.f32.mrb[6].mxu0  ;;  %v667_v2 = vmul.f32 %v1291_v53, %v1657_v19 }
 0x11e   : > { %v783_v60 = vmul.f32 0.2, %v719_v48  ;;  %v1308_v0 = vpop.f32.mrb[6].mxu1  ;;  %957 = vst.msk [vmem:[%s1683_s18] sm:$0xf] %vm956_vm1, %v1228_v55  ;;  %v799_v1 = vsel %vm735_vm6, %v703_v47, %v767_v57  ;;  %v683_v3 = vmul.f32 %v1307_v54, %v1657_v19  ;;  %v665_v4 = vmul.f32 %v1657_v19, %v543_v58  ;;  %v546_v5 = vpop.f32.mrb[7].mxu0 }
 0x11f   : > { %973 = vst.msk [vmem:[%s1683_s18 + $0x40] sm:$0xf] %vm956_vm1, %v1244_v56  ;;  %v610_v6 = vpop.f32.mrb[7].mxu1  ;;  %v1231_v7 = vpack.c.bf16 %v799_v1, %v799_v1  ;;  %vm733_vm8 = vcmp.ge.f32.partialorder %v701_v61, 0.0  ;;  %v765_v9 = vmul.f32 0.2, %v701_v61  ;;  %v706_v12 = vadd.f32 %v1665_v21, %v667_v2 }
 0x120   : > { %v815_v8 = vsel %vm751_vm7, %v719_v48, %v783_v60  ;;  %vm749_vm9 = vcmp.ge.f32.partialorder %v717_v62, 0.0  ;;  %v781_v11 = vmul.f32 0.2, %v717_v62  ;;  %v722_v14 = vadd.f32 %v1665_v21, %v683_v3 }
 0x121   : > { %v1247_v10 = vpack.c.bf16 %v815_v8, %v815_v8  ;;  %960 = vst.msk [vmem:[%s1683_s18 + $0xc] sm:$0xf] %vm956_vm1, %v1231_v7  ;;  %v797_v13 = vsel %vm733_vm8, %v701_v61, %v765_v9  ;;  %v704_v15 = vadd.f32 %v1665_v21, %v665_v4  ;;  %v681_v16 = vmul.f32 %v1657_v19, %v607_v59 }
 0x122   : > { %v1229_v17 = vpack.c.bf16 %v797_v13, %v797_v13  ;;  %v813_v18 = vsel %vm749_vm9, %v717_v62, %v781_v11  ;;  %vm738_vm10 = vcmp.ge.f32.partialorder %v706_v12, 0.0  ;;  %v770_v20 = vmul.f32 0.2, %v706_v12 }
 0x123   : > { %976 = vst.msk [vmem:[%s1683_s18 + $0x4c] sm:$0xf] %vm956_vm1, %v1247_v10  ;;  %v1245_v22 = vpack.c.bf16 %v813_v18, %v813_v18  ;;  %vm754_vm11 = vcmp.ge.f32.partialorder %v722_v14, 0.0  ;;  %v786_v23 = vmul.f32 0.2, %v722_v14  ;;  %vm736_vm12 = vcmp.ge.f32.partialorder %v704_v15, 0.0 }
 0x124   : > { %v1295_v24 = vpop.f32.mrb[8].mxu0  ;;  %v1311_v25 = vpop.f32.mrb[8].mxu1  ;;  %958 = vst.msk [vmem:[%s1683_s18 + $0x4] sm:$0xf] %vm956_vm1, %v1229_v17  ;;  %v802_v26 = vsel %vm738_vm10, %v706_v12, %v770_v20  ;;  %v768_v27 = vmul.f32 0.2, %v704_v15  ;;  %v720_v28 = vadd.f32 %v1665_v21, %v681_v16  ;;  %v668_v29 = vmul.f32 %v1292_v63, %v1657_v19 }
 0x125   : > { %v559_v30 = vpop.f32.mrb[9].mxu0  ;;  %v623_v31 = vpop.f32.mrb[9].mxu1  ;;  %974 = vst.msk [vmem:[%s1683_s18 + $0x44] sm:$0xf] %vm956_vm1, %v1245_v22  ;;  %v1234_v32 = vpack.c.bf16 %v802_v26, %v802_v26  ;;  %v818_v33 = vsel %vm754_vm11, %v722_v14, %v786_v23  ;;  %v684_v34 = vmul.f32 %v1308_v0, %v1657_v19  ;;  %v666_v35 = vmul.f32 %v1657_v19, %v546_v5 }
 0x126   : > { %v1296_v36 = vpop.f32.mrb[10].mxu0  ;;  %v1312_v37 = vpop.f32.mrb[10].mxu1  ;;  %v1250_v38 = vpack.c.bf16 %v818_v33, %v818_v33  ;;  %v800_v39 = vsel %vm736_vm12, %v704_v15, %v768_v27  ;;  %vm752_vm13 = vcmp.ge.f32.partialorder %v720_v28, 0.0  ;;  %v784_v40 = vmul.f32 0.2, %v720_v28 }
 0x127   : > { %v1717_v41 = vpop.f32.mrb[11].mxu0  ;;  %v1719_v42 = vpop.f32.mrb[11].mxu1  ;;  %963 = vst.msk [vmem:[%s1683_s18 + $0x18] sm:$0xf] %vm956_vm1, %v1234_v32  ;;  %v1232_v43 = vpack.c.bf16 %v800_v39, %v800_v39  ;;  %v707_v44 = vadd.f32 %v1665_v21, %v668_v29  ;;  %v723_v45 = vadd.f32 %v1665_v21, %v684_v34  ;;  %v705_v46 = vadd.f32 %v1665_v21, %v666_v35 }
 0x128   : > { %979 = vst.msk [vmem:[%s1683_s18 + $0x58] sm:$0xf] %vm956_vm1, %v1250_v38  ;;  %v816_v47 = vsel %vm752_vm13, %v720_v28, %v784_v40  ;;  %v682_v48 = vmul.f32 %v1657_v19, %v610_v6  ;;  %v671_v49 = vmul.f32 %v1295_v24, %v1657_v19  ;;  %v687_v50 = vmul.f32 %v1311_v25, %v1657_v19 }
 0x129   : > { %961 = vst.msk [vmem:[%s1683_s18 + $0x10] sm:$0xf] %vm956_vm1, %v1232_v43  ;;  %v1248_v51 = vpack.c.bf16 %v816_v47, %v816_v47  ;;  %vm739_vm14 = vcmp.ge.f32.partialorder %v707_v44, 0.0  ;;  %v771_v52 = vmul.f32 0.2, %v707_v44  ;;  %vm755_vm15 = vcmp.ge.f32.partialorder %v723_v45, 0.0 }
 0x12a   : > { %v787_v53 = vmul.f32 0.2, %v723_v45  ;;  %vm737_vm0 = vcmp.ge.f32.partialorder %v705_v46, 0.0  ;;  %v769_v54 = vmul.f32 0.2, %v705_v46  ;;  %v721_v55 = vadd.f32 %v1665_v21, %v682_v48 }
 0x12b   : > { %977 = vst.msk [vmem:[%s1683_s18 + $0x50] sm:$0xf] %vm956_vm1, %v1248_v51  ;;  %v803_v56 = vsel %vm739_vm14, %v707_v44, %v771_v52  ;;  %v710_v57 = vadd.f32 %v1665_v21, %v671_v49  ;;  %v726_v58 = vadd.f32 %v1665_v21, %v687_v50  ;;  %v669_v59 = vmul.f32 %v1657_v19, %v559_v30  ;;  %v1299_v60 = vpop.f32.mrb[12].mxu0  ;;  %v1315_v61 = vpop.f32.mrb[12].mxu1 }
 0x12c   : > { %v1235_v62 = vpack.c.bf16 %v803_v56, %v803_v56  ;;  %v819_v63 = vsel %vm755_vm15, %v723_v45, %v787_v53  ;;  %v801_v0 = vsel %vm737_vm0, %v705_v46, %v769_v54  ;;  %vm753_vm2 = vcmp.ge.f32.partialorder %v721_v55, 0.0  ;;  %v1739_v1 = vpop.f32.mrb[13].mxu0  ;;  %v1741_v2 = vpop.f32.mrb[13].mxu1 }
 0x12d   : > { %v1251_v3 = vpack.c.bf16 %v819_v63, %v819_v63  ;;  %v1233_v4 = vpack.c.bf16 %v801_v0, %v801_v0  ;;  %v785_v5 = vmul.f32 0.2, %v721_v55  ;;  %vm742_vm3 = vcmp.ge.f32.partialorder %v710_v57, 0.0  ;;  %v1743_v6 = vpop.f32.mrb[14].mxu0  ;;  %v1745_v7 = vpop.f32.mrb[14].mxu1 }
 0x12e   : > { %964 = vst.msk [vmem:[%s1683_s18 + $0x1c] sm:$0xf] %vm956_vm1, %v1235_v62  ;;  %v774_v8 = vmul.f32 0.2, %v710_v57  ;;  %vm758_vm4 = vcmp.ge.f32.partialorder %v726_v58, 0.0  ;;  %v708_v10 = vadd.f32 %v1665_v21, %v669_v59  ;;  %v1750_v11 = vpop.f32.mrb[15].mxu0  ;;  %v685_v13 = vmul.f32 %v1657_v19, %v623_v31 }
 0x12f   : > { %v790_v9 = vmul.f32 0.2, %v726_v58  ;;  %980 = vst.msk [vmem:[%s1683_s18 + $0x5c] sm:$0xf] %vm956_vm1, %v1251_v3  ;;  %962 = vst.msk [vmem:[%s1683_s18 + $0x14] sm:$0xf] %vm956_vm1, %v1233_v4  ;;  %v817_v12 = vsel %vm753_vm2, %v721_v55, %v785_v5  ;;  %v672_v14 = vmul.f32 %v1296_v36, %v1657_v19  ;;  %v688_v15 = vmul.f32 %v1312_v37, %v1657_v19 }
 0x130   : > { %v1760_v16 = vpop.f32.mrb[15].mxu1  ;;  %v1249_v17 = vpack.c.bf16 %v817_v12, %v817_v12  ;;  %v806_v18 = vsel %vm742_vm3, %v710_v57, %v774_v8  ;;  %vm740_vm5 = vcmp.ge.f32.partialorder %v708_v10, 0.0  ;;  %v772_v24 = vmul.f32 0.2, %v708_v10 }
 0x131   : > { %v822_v20 = vsel %vm758_vm4, %v726_v58, %v790_v9  ;;  %v1238_v22 = vpack.c.bf16 %v806_v18, %v806_v18  ;;  %v724_v25 = vadd.f32 %v1665_v21, %v685_v13  ;;  %v711_v26 = vadd.f32 %v1665_v21, %v672_v14 }
 0x132   : > { %v1254_v23 = vpack.c.bf16 %v822_v20, %v822_v20  ;;  %978 = vst.msk [vmem:[%s1683_s18 + $0x54] sm:$0xf] %vm956_vm1, %v1249_v17  ;;  %v727_v27 = vadd.f32 %v1665_v21, %v688_v15  ;;  %v670_v28 = vmul.f32 %v1657_v19, %v1717_v41  ;;  %v686_v29 = vmul.f32 %v1657_v19, %v1719_v42 }
 0x133   : > { %967 = vst.msk [vmem:[%s1683_s18 + $0x28] sm:$0xf] %vm956_vm1, %v1238_v22  ;;  %v804_v30 = vsel %vm740_vm5, %v708_v10, %v772_v24  ;;  %vm756_vm6 = vcmp.ge.f32.partialorder %v724_v25, 0.0  ;;  %v788_v31 = vmul.f32 0.2, %v724_v25  ;;  %v675_v32 = vmul.f32 %v1299_v60, %v1657_v19 }
 0x134   : > { %983 = vst.msk [vmem:[%s1683_s18 + $0x68] sm:$0xf] %vm956_vm1, %v1254_v23  ;;  %v1236_v33 = vpack.c.bf16 %v804_v30, %v804_v30  ;;  %vm743_vm7 = vcmp.ge.f32.partialorder %v711_v26, 0.0  ;;  %v775_v34 = vmul.f32 0.2, %v711_v26  ;;  %vm759_vm8 = vcmp.ge.f32.partialorder %v727_v27, 0.0 }
 0x135   : > { %v820_v35 = vsel %vm756_vm6, %v724_v25, %v788_v31  ;;  %v791_v36 = vmul.f32 0.2, %v727_v27  ;;  %v709_v37 = vadd.f32 %v1665_v21, %v670_v28  ;;  %v725_v38 = vadd.f32 %v1665_v21, %v686_v29 }
 0x136   : > { %965 = vst.msk [vmem:[%s1683_s18 + $0x20] sm:$0xf] %vm956_vm1, %v1236_v33  ;;  %v1252_v39 = vpack.c.bf16 %v820_v35, %v820_v35  ;;  %v807_v40 = vsel %vm743_vm7, %v711_v26, %v775_v34  ;;  %v714_v41 = vadd.f32 %v1665_v21, %v675_v32  ;;  %v691_v42 = vmul.f32 %v1315_v61, %v1657_v19 }
 0x137   : > { %v1239_v43 = vpack.c.bf16 %v807_v40, %v807_v40  ;;  %v823_v44 = vsel %vm759_vm8, %v727_v27, %v791_v36  ;;  %vm741_vm9 = vcmp.ge.f32.partialorder %v709_v37, 0.0  ;;  %v773_v45 = vmul.f32 0.2, %v709_v37 }
 0x138   : > { %981 = vst.msk [vmem:[%s1683_s18 + $0x60] sm:$0xf] %vm956_vm1, %v1252_v39  ;;  %v1255_v46 = vpack.c.bf16 %v823_v44, %v823_v44  ;;  %vm757_vm10 = vcmp.ge.f32.partialorder %v725_v38, 0.0  ;;  %v789_v47 = vmul.f32 0.2, %v725_v38  ;;  %vm746_vm11 = vcmp.ge.f32.partialorder %v714_v41, 0.0 }
 0x139   : > { %968 = vst.msk [vmem:[%s1683_s18 + $0x2c] sm:$0xf] %vm956_vm1, %v1239_v43  ;;  %v805_v48 = vsel %vm741_vm9, %v709_v37, %v773_v45  ;;  %v778_v49 = vmul.f32 0.2, %v714_v41  ;;  %v730_v50 = vadd.f32 %v1665_v21, %v691_v42  ;;  %v673_v51 = vmul.f32 %v1657_v19, %v1739_v1 }
 0x13a   : > { %984 = vst.msk [vmem:[%s1683_s18 + $0x6c] sm:$0xf] %vm956_vm1, %v1255_v46  ;;  %v1237_v52 = vpack.c.bf16 %v805_v48, %v805_v48  ;;  %v821_v53 = vsel %vm757_vm10, %v725_v38, %v789_v47  ;;  %v689_v54 = vmul.f32 %v1657_v19, %v1741_v2  ;;  %v676_v55 = vmul.f32 %v1743_v6, %v1657_v19 }
 0x13b   : > { %v1253_v56 = vpack.c.bf16 %v821_v53, %v821_v53  ;;  %v810_v57 = vsel %vm746_vm11, %v714_v41, %v778_v49  ;;  %vm762_vm12 = vcmp.ge.f32.partialorder %v730_v50, 0.0  ;;  %v794_v58 = vmul.f32 0.2, %v730_v50 }
 0x13c   : > { %966 = vst.msk [vmem:[%s1683_s18 + $0x24] sm:$0xf] %vm956_vm1, %v1237_v52  ;;  %v1242_v59 = vpack.c.bf16 %v810_v57, %v810_v57  ;;  %v712_v60 = vadd.f32 %v1665_v21, %v673_v51  ;;  %v728_v61 = vadd.f32 %v1665_v21, %v689_v54  ;;  %v715_v62 = vadd.f32 %v1665_v21, %v676_v55 }
 0x13d   : > { %982 = vst.msk [vmem:[%s1683_s18 + $0x64] sm:$0xf] %vm956_vm1, %v1253_v56  ;;  %v826_v63 = vsel %vm762_vm12, %v730_v50, %v794_v58  ;;  %v692_v0 = vmul.f32 %v1745_v7, %v1657_v19  ;;  %v674_v1 = vmul.f32 %v1657_v19, %v1750_v11  ;;  %v690_v2 = vmul.f32 %v1657_v19, %v1760_v16 }
 0x13e   : > { %971 = vst.msk [vmem:[%s1683_s18 + $0x38] sm:$0xf] %vm956_vm1, %v1242_v59  ;;  %v1258_v3 = vpack.c.bf16 %v826_v63, %v826_v63  ;;  %vm744_vm13 = vcmp.ge.f32.partialorder %v712_v60, 0.0  ;;  %v776_v4 = vmul.f32 0.2, %v712_v60  ;;  %vm760_vm14 = vcmp.ge.f32.partialorder %v728_v61, 0.0 }
 0x13f   : > { %v792_v5 = vmul.f32 0.2, %v728_v61  ;;  %vm747_vm15 = vcmp.ge.f32.partialorder %v715_v62, 0.0  ;;  %v779_v6 = vmul.f32 0.2, %v715_v62  ;;  %v731_v8 = vadd.f32 %v1665_v21, %v692_v0 }
 0x140   : > { %987 = vst.msk [vmem:[%s1683_s18 + $0x78] sm:$0xf] %vm956_vm1, %v1258_v3  ;;  %v808_v7 = vsel %vm744_vm13, %v712_v60, %v776_v4  ;;  %v713_v9 = vadd.f32 %v1665_v21, %v674_v1  ;;  %v729_v19 = vadd.f32 %v1665_v21, %v690_v2 }
 0x141   : > { %v1240_v10 = vpack.c.bf16 %v808_v7, %v808_v7  ;;  %v824_v11 = vsel %vm760_vm14, %v728_v61, %v792_v5  ;;  %v811_v12 = vsel %vm747_vm15, %v715_v62, %v779_v6  ;;  %vm763_vm0 = vcmp.ge.f32.partialorder %v731_v8, 0.0 }
 0x142   : > { %v1256_v13 = vpack.c.bf16 %v824_v11, %v824_v11  ;;  %v1243_v14 = vpack.c.bf16 %v811_v12, %v811_v12  ;;  %v795_v15 = vmul.f32 0.2, %v731_v8  ;;  %vm745_vm2 = vcmp.ge.f32.partialorder %v713_v9, 0.0 }
 0x143   : > { %969 = vst.msk [vmem:[%s1683_s18 + $0x30] sm:$0xf] %vm956_vm1, %v1240_v10  ;;  %v777_v16 = vmul.f32 0.2, %v713_v9  ;;  %vm761_vm3 = vcmp.ge.f32.partialorder %v729_v19, 0.0 }
 0x144   : > { %v793_v17 = vmul.f32 0.2, %v729_v19  ;;  %985 = vst.msk [vmem:[%s1683_s18 + $0x70] sm:$0xf] %vm956_vm1, %v1256_v13  ;;  %972 = vst.msk [vmem:[%s1683_s18 + $0x3c] sm:$0xf] %vm956_vm1, %v1243_v14  ;;  %v827_v21 = vsel %vm763_vm0, %v731_v8, %v795_v15 }
 0x145   : > { %v1259_v18 = vpack.c.bf16 %v827_v21, %v827_v21  ;;  %v809_v20 = vsel %vm745_vm2, %v713_v9, %v777_v16 }
 0x146   : > { %v825_v22 = vsel %vm761_vm3, %v729_v19, %v793_v17  ;;  %v1241_v23 = vpack.c.bf16 %v809_v20, %v809_v20 }
 0x147   : > { %v1257_v24 = vpack.c.bf16 %v825_v22, %v825_v22  ;;  %988 = vst.msk [vmem:[%s1683_s18 + $0x7c] sm:$0xf] %vm956_vm1, %v1259_v18 }
 0x148   : > { %970 = vst.msk [vmem:[%s1683_s18 + $0x34] sm:$0xf] %vm956_vm1, %v1241_v23 }
 0x149   : > { %986 = vst.msk [vmem:[%s1683_s18 + $0x74] sm:$0xf] %vm956_vm1, %v1257_v24 }
 0x14a PF: > { %s17_s20 = sadd.s32 1, %s1479_s20   ;;  %s1854_s15 = smov %s1463_s16 }
 0x14b   : > { %p14_p9 = scmp.ge.s32.totalorder %s17_s20, 4   ;;  %s1855_s16 = smov %s1467_s17 }
 0x14c   : > { %s1856_s17 = smov %s1558_s27  ;;  %s1857_s18 = smov %s1475_s19 }
 0x14d   : > { %s1858_s19 = smov %s1860_s22  ;;  %16 = sbr.rel (!%p14_p9) target bundleno = 4 (0x4), region = 86 }
 0x154   :  { %1027 = vsyncpa [#allocation3], 1 }
 0x155   :  { %1029 = vsyncpa [#allocation3 + $0x1], 1 }

</bundles_post_ra>
